<compile_context>
chip_gen: v5e
topology: v5e:2x2
jax: 0.10.0
libtpu: 0.0.40
codegen_flags: <defaults>
</compile_context>

<pallas_src>
import functools
import math

import jax
import jax.numpy as jnp
from jax.experimental import pallas as pl
from jax.experimental.pallas import tpu as pltpu


def _cdiv(a, b):
    return -(-a // b)


def _choose_batch_tile(batch, num_points, target_rows=1024):
    """Pick batch elements per grid step (bt) and the number of steps G.

    One fat step unless there is more than ~target_rows of row work: the grid
    is a serial loop on v5e/v6e, so extra steps only add ~0.35us each and
    shrink the MXU M dimension.  When we do split, bt*N is rounded up to a
    multiple of 128 so every (D, bt*N) input block is lane-dense/legal.
    """
    n = max(num_points, 1)
    bt = max(1, min(batch, _cdiv(target_rows, n)))
    if bt >= batch:
        return batch, 1                       # single step: block == full array
    lane_step = 128 // math.gcd(n, 128)       # smallest bt with bt*n % 128 == 0
    bt = _cdiv(bt, lane_step) * lane_step
    g = _cdiv(batch, bt)
    if g <= 1:
        return batch, 1
    return bt, g


def _encoder_kernel(xt_ref, yt_ref, w_ref, pool_ref, out_ref, *,
                    compute_dtype, vpu_first_layer):
    dx = xt_ref.shape[0]
    dy = yt_ref.shape[0]
    latent = w_ref.shape[0]
    mb = xt_ref.shape[-1]
    din = dx + dy

    # Column offsets inside the packed slab [W1^T | b1 | W2^T | b2 | W3^T | b3].
    o_b1 = din
    o_w2 = o_b1 + 1
    o_b2 = o_w2 + latent
    o_w3 = o_b2 + 1
    o_b3 = o_w3 + latent

    b1 = w_ref[:, o_b1:o_b1 + 1]                     # (L, 1) f32
    b2 = w_ref[:, o_b2:o_b2 + 1]
    b3 = w_ref[:, o_b3:o_b3 + 1]

    xt = xt_ref[...]                                  # (Dx, mb) f32, lane dim = mb
    yt = yt_ref[...]

    if vpu_first_layer:
        # Tiny Din: layer 1 as Din lane-dense broadcast FMAs on the VPU (f32),
        # fusing the x/y concat (no (B,N,Din) array, no wasted K=Din MXU pass).
        h = jnp.broadcast_to(b1, (latent, mb))        # hoisted out of the loop
        for d in range(dx):
            h = h + w_ref[:, d:d + 1] * xt[d:d + 1, :]
        for d in range(dy):
            h = h + w_ref[:, dx + d:dx + d + 1] * yt[d:d + 1, :]
    else:
        h = (jnp.dot(w_ref[:, 0:dx].astype(compute_dtype),
                     xt.astype(compute_dtype),
                     preferred_element_type=jnp.float32)
             + jnp.dot(w_ref[:, dx:din].astype(compute_dtype),
                       yt.astype(compute_dtype),
                       preferred_element_type=jnp.float32)
             + b1)

    h = jnp.maximum(h, 0.0)
    h = jnp.dot(w_ref[:, o_w2:o_w2 + latent].astype(compute_dtype),
                h.astype(compute_dtype),
                preferred_element_type=jnp.float32) + b2
    h = jnp.maximum(h, 0.0)
    h = jnp.dot(w_ref[:, o_w3:o_w3 + latent].astype(compute_dtype),
                h.astype(compute_dtype),
                preferred_element_type=jnp.float32) + b3

    # Mean over the N context points of each batch slot: one f32 MXU dot with
    # the (mb, bt) block-averaging matrix (any N, no reshape relayout).
    pooled = jnp.dot(h, pool_ref[...], preferred_element_type=jnp.float32)
    out_ref[...] = pooled[None].astype(out_ref.dtype)            # (1, L, bt)


def _make_encoder_call(grid_g, bt, mb, dx, dy, latent, slab_cols,
                       compute_dtype, vpu_first, single_buffer_consts, cost):
    kernel = functools.partial(_encoder_kernel,
                               compute_dtype=compute_dtype,
                               vpu_first_layer=vpu_first)

    def const_spec(shape):
        zero_map = lambda g, _n=len(shape): (0,) * _n
        if single_buffer_consts:
            return pl.BlockSpec(shape, zero_map, pipeline_mode=pl.Buffered(1))
        return pl.BlockSpec(shape, zero_map)

    return pl.pallas_call(
        kernel,
        out_shape=jax.ShapeDtypeStruct((grid_g, latent, bt), jnp.float32),
        grid_spec=pltpu.PrefetchScalarGridSpec(
            num_scalar_prefetch=0,
            grid=(grid_g,),
            in_specs=[
                pl.BlockSpec((dx, mb), lambda g: (0, g)),   # x^T block (lane-dense)
                pl.BlockSpec((dy, mb), lambda g: (0, g)),   # y^T block (lane-dense)
                const_spec((latent, slab_cols)),            # packed weights/biases
                const_spec((mb, bt)),                       # block-averaging matrix
            ],
            out_specs=pl.BlockSpec((1, latent, bt), lambda g: (g, 0, 0)),
        ),
        compiler_params=pltpu.CompilerParams(
            dimension_semantics=("parallel",),
            vmem_limit_bytes=32 * 1024 * 1024),
        cost_estimate=cost,
    )


def standard_encoder_pallas(x_context, y_context, params,
                            compute_dtype=jnp.bfloat16):
    """StandardEncoder forward pass via a Pallas TPU kernel.

    Args:
      x_context: (B, N, Dx) float32
      y_context: (B, N, Dy) float32
      params: dict with w1 (Dx+Dy, L), b1 (1, L), w2 (L, L), b2 (1, L),
              w3 (L, L), b3 (1, L) in float32
      compute_dtype: dtype fed to the MXU matmuls (f32 accumulation always).
    Returns:
      (B, 1, L) float32
    """
    B, N, Dx = x_context.shape
    Dy = y_context.shape[-1]
    Din = Dx + Dy
    L = params["w1"].shape[1]

    bt, G = _choose_batch_tile(B, N)
    B_pad = G * bt
    if B_pad != B:
        pad = B_pad - B
        x_context = jnp.pad(x_context, ((0, pad), (0, 0), (0, 0)))
        y_context = jnp.pad(y_context, ((0, pad), (0, 0), (0, 0)))
    mb = bt * N

    # Feature-major inputs so every DMA'd block is lane-dense in m = bt*N.
    xt = x_context.reshape(B_pad * N, Dx).T.astype(jnp.float32)   # (Dx, B_pad*N)
    yt = y_context.reshape(B_pad * N, Dy).T.astype(jnp.float32)   # (Dy, B_pad*N)

    # Single resident f32 weight slab: [W1^T | b1 | W2^T | b2 | W3^T | b3].
    slab = jnp.concatenate(
        [params["w1"].T, jnp.reshape(params["b1"], (L, 1)),
         params["w2"].T, jnp.reshape(params["b2"], (L, 1)),
         params["w3"].T, jnp.reshape(params["b3"], (L, 1))],
        axis=1).astype(jnp.float32)
    slab_cols = Din + 3 + 2 * L

    # Block-averaging matrix: pool[j, b] = 1/N iff point j belongs to slot b.
    pool = jnp.repeat(jnp.eye(bt, dtype=jnp.float32) / float(N), N, axis=0)

    vpu_first = Din <= 8

    rows = B_pad * N
    flops = 2 * rows * (Din * L + 2 * L * L) + 2 * L * rows * bt
    bytes_accessed = (4 * rows * Din + 4 * int(slab.size) + 4 * int(pool.size)
                      + 4 * G * L * bt)
    cost = pl.CostEstimate(flops=int(flops), transcendentals=0,
                           bytes_accessed=int(bytes_accessed))

    args = (xt, yt, slab, pool)
    try:
        out3 = _make_encoder_call(G, bt, mb, Dx, Dy, L, slab_cols,
                                  compute_dtype, vpu_first, True, cost)(*args)
        out3 = jax.block_until_ready(out3)
    except Exception:
        # Fallback if single-buffering via pl.Buffered(1) is unavailable.
        out3 = _make_encoder_call(G, bt, mb, Dx, Dy, L, slab_cols,
                                  compute_dtype, vpu_first, False, cost)(*args)

    # (G, L, bt) -> (B, 1, L); padded batch slots are sliced off before return.
    return out3.transpose(0, 2, 1).reshape(B_pad, L)[:B].reshape(B, 1, L)


def standard_encoder_ref(x_context, y_context, params):
    """Pure-JAX f32 reference for correctness checking."""
    xy = jnp.concatenate([x_context, y_context], axis=-1)
    h = jnp.maximum(xy @ params["w1"] + params["b1"], 0.0)
    h = jnp.maximum(h @ params["w2"] + params["b2"], 0.0)
    h = h @ params["w3"] + params["b3"]
    return jnp.mean(h, axis=1, keepdims=True)


def init_params(key, input_dim, latent_dim):
    """Deterministic synthetic init (analogue of init_sequential_weights)."""
    ks = jax.random.split(key, 6)
    scale = lambda fan_in: 1.0 / jnp.sqrt(jnp.float32(fan_in))
    return {
        "w1": jax.random.normal(ks[0], (input_dim, latent_dim), jnp.float32) * scale(input_dim),
        "b1": jax.random.normal(ks[1], (1, latent_dim), jnp.float32) * 0.01,
        "w2": jax.random.normal(ks[2], (latent_dim, latent_dim), jnp.float32) * scale(latent_dim),
        "b2": jax.random.normal(ks[3], (1, latent_dim), jnp.float32) * 0.01,
        "w3": jax.random.normal(ks[4], (latent_dim, latent_dim), jnp.float32) * scale(latent_dim),
        "b3": jax.random.normal(ks[5], (1, latent_dim), jnp.float32) * 0.01,
    }


if __name__ == "__main__":
    # StandardEncoder(input_dim=4, latent_dim=32): batch=2, num_context=8,
    # input_dim_x=2, input_dim_y=2.
    B, N, Dx, Dy, L = 2, 8, 2, 2, 32
    key = jax.random.PRNGKey(0)
    kx, ky, kp = jax.random.split(key, 3)

    x_context = jax.random.normal(kx, (B, N, Dx), jnp.float32)
    y_context = jax.random.normal(ky, (B, N, Dy), jnp.float32)
    params = init_params(kp, Dx + Dy, L)
    ref = standard_encoder_ref(x_context, y_context, params)

    # f32 compute path vs. reference (both sides lower f32 matmuls to
    # multi-pass bf16 on the MXU, so allow a small tolerance).
    out_f32 = jax.block_until_ready(
        standard_encoder_pallas(x_context, y_context, params,
                                compute_dtype=jnp.float32))
    assert out_f32.shape == (B, 1, L), out_f32.shape
    assert jnp.allclose(out_f32, ref, atol=1e-4, rtol=1e-4), "f32 mismatch"

    # Performance path: bf16 MXU operands, f32 accumulation.
    out_bf16 = jax.block_until_ready(
        standard_encoder_pallas(x_context, y_context, params))
    assert out_bf16.shape == (B, 1, L), out_bf16.shape
    assert jnp.allclose(out_bf16, ref, atol=3e-2, rtol=3e-2), "bf16 mismatch"

    # Odd batch + N that is not a multiple of 8 (pool-as-matmul handles it).
    B2, N2 = 5, 5
    kx2, ky2 = jax.random.split(jax.random.PRNGKey(1), 2)
    x2 = jax.random.normal(kx2, (B2, N2, Dx), jnp.float32)
    y2 = jax.random.normal(ky2, (B2, N2, Dy), jnp.float32)
    ref2 = standard_encoder_ref(x2, y2, params)
    out2 = jax.block_until_ready(standard_encoder_pallas(x2, y2, params))
    assert out2.shape == (B2, 1, L), out2.shape
    assert jnp.allclose(out2, ref2, atol=3e-2, rtol=3e-2), "odd-shape mismatch"

    # Multi-step grid + batch padding (B=200, N=8 -> bt=128, G=2, pad=56):
    # exercises lane-dense 1024-wide input blocks and 128-lane output stores.
    B3 = 200
    kx3, ky3 = jax.random.split(jax.random.PRNGKey(2), 2)
    x3 = jax.random.normal(kx3, (B3, N, Dx), jnp.float32)
    y3 = jax.random.normal(ky3, (B3, N, Dy), jnp.float32)
    ref3 = standard_encoder_ref(x3, y3, params)
    out3 = jax.block_until_ready(standard_encoder_pallas(x3, y3, params))
    assert out3.shape == (B3, 1, L), out3.shape
    assert jnp.allclose(out3, ref3, atol=3e-2, rtol=3e-2), "multi-step mismatch"

    # TODO(synk): use_attention=True (CrossAttention pooling) is not exercised
    # by the default StandardEncoder; only the MeanPooling path is implemented.
    print("KERNEL_OK")
</pallas_src>

<mosaic_0001>
module attributes {stable_mosaic.version = 11 : i64} {
  func.func @_encoder_kernel(%arg0: i32, %arg1: memref<2x16xf32, #tpu.memory_space<vmem>>, %arg2: memref<2x16xf32, #tpu.memory_space<vmem>>, %arg3: memref<32x71xf32, #tpu.memory_space<vmem>>, %arg4: memref<16x2xf32, #tpu.memory_space<vmem>>, %arg5: memref<1x32x2xf32, #tpu.memory_space<vmem>>) attributes {dimension_semantics = [#tpu.dimension_semantics<parallel>], iteration_bounds = array<i64: 1>, scalar_prefetch = 0 : i64, scratch_operands = 0 : i64, tpu.core_type = #tpu.core_type<tc>, window_params = [{transform_indices = @transform_0, window_bounds = array<i64: 2, 16>}, {transform_indices = @transform_1, window_bounds = array<i64: 2, 16>}, {pipeline_mode = #tpu.pipeline_mode<synchronous>, transform_indices = @transform_2, window_bounds = array<i64: 32, 71>}, {pipeline_mode = #tpu.pipeline_mode<synchronous>, transform_indices = @transform_3, window_bounds = array<i64: 16, 2>}, {transform_indices = @transform_4, window_bounds = array<i64: 1, 32, 2>}]} {
    %c0 = arith.constant 0 : index
    %c4 = arith.constant 4 : index
    %0 = vector.load %arg3[%c0, %c4] : memref<32x71xf32, #tpu.memory_space<vmem>>, vector<32x1xf32>
    %c0_0 = arith.constant 0 : index
    %c37 = arith.constant 37 : index
    %1 = vector.load %arg3[%c0_0, %c37] : memref<32x71xf32, #tpu.memory_space<vmem>>, vector<32x1xf32>
    %c0_1 = arith.constant 0 : index
    %c70 = arith.constant 70 : index
    %2 = vector.load %arg3[%c0_1, %c70] : memref<32x71xf32, #tpu.memory_space<vmem>>, vector<32x1xf32>
    %c0_2 = arith.constant 0 : index
    %c0_3 = arith.constant 0 : index
    %3 = vector.load %arg1[%c0_2, %c0_3] : memref<2x16xf32, #tpu.memory_space<vmem>>, vector<2x16xf32>
    %c0_4 = arith.constant 0 : index
    %c0_5 = arith.constant 0 : index
    %4 = vector.load %arg2[%c0_4, %c0_5] : memref<2x16xf32, #tpu.memory_space<vmem>>, vector<2x16xf32>
    %5 = vector.shape_cast %0 : vector<32x1xf32> to vector<32x1xf32>
    %6 = vector.broadcast %5 : vector<32x1xf32> to vector<32x16xf32>
    %c0_6 = arith.constant 0 : index
    %c0_7 = arith.constant 0 : index
    %7 = vector.load %arg3[%c0_6, %c0_7] : memref<32x71xf32, #tpu.memory_space<vmem>>, vector<32x1xf32>
    %8 = vector.extract_strided_slice %3 {offsets = [0, 0], sizes = [1, 16], strides = [1, 1]} : vector<2x16xf32> to vector<1x16xf32>
    %9 = vector.broadcast %7 : vector<32x1xf32> to vector<32x16xf32>
    %10 = vector.broadcast %8 : vector<1x16xf32> to vector<32x16xf32>
    %11 = arith.mulf %9, %10 : vector<32x16xf32>
    %12 = arith.addf %6, %11 : vector<32x16xf32>
    %c0_8 = arith.constant 0 : index
    %c1 = arith.constant 1 : index
    %13 = vector.load %arg3[%c0_8, %c1] : memref<32x71xf32, #tpu.memory_space<vmem>>, vector<32x1xf32>
    %14 = vector.extract_strided_slice %3 {offsets = [1, 0], sizes = [1, 16], strides = [1, 1]} : vector<2x16xf32> to vector<1x16xf32>
    %15 = vector.broadcast %13 : vector<32x1xf32> to vector<32x16xf32>
    %16 = vector.broadcast %14 : vector<1x16xf32> to vector<32x16xf32>
    %17 = arith.mulf %15, %16 : vector<32x16xf32>
    %18 = arith.addf %12, %17 : vector<32x16xf32>
    %c0_9 = arith.constant 0 : index
    %c2 = arith.constant 2 : index
    %19 = vector.load %arg3[%c0_9, %c2] : memref<32x71xf32, #tpu.memory_space<vmem>>, vector<32x1xf32>
    %20 = vector.extract_strided_slice %4 {offsets = [0, 0], sizes = [1, 16], strides = [1, 1]} : vector<2x16xf32> to vector<1x16xf32>
    %21 = vector.broadcast %19 : vector<32x1xf32> to vector<32x16xf32>
    %22 = vector.broadcast %20 : vector<1x16xf32> to vector<32x16xf32>
    %23 = arith.mulf %21, %22 : vector<32x16xf32>
    %24 = arith.addf %18, %23 : vector<32x16xf32>
    %c0_10 = arith.constant 0 : index
    %c3 = arith.constant 3 : index
    %25 = vector.load %arg3[%c0_10, %c3] : memref<32x71xf32, #tpu.memory_space<vmem>>, vector<32x1xf32>
    %26 = vector.extract_strided_slice %4 {offsets = [1, 0], sizes = [1, 16], strides = [1, 1]} : vector<2x16xf32> to vector<1x16xf32>
    %27 = vector.broadcast %25 : vector<32x1xf32> to vector<32x16xf32>
    %28 = vector.broadcast %26 : vector<1x16xf32> to vector<32x16xf32>
    %29 = arith.mulf %27, %28 : vector<32x16xf32>
    %30 = arith.addf %24, %29 : vector<32x16xf32>
    %cst = arith.constant 0.000000e+00 : f32
    %31 = vector.broadcast %cst : f32 to vector<32x16xf32>
    %32 = arith.maximumf %30, %31 : vector<32x16xf32>
    %c0_11 = arith.constant 0 : index
    %c5 = arith.constant 5 : index
    %33 = vector.load %arg3[%c0_11, %c5] : memref<32x71xf32, #tpu.memory_space<vmem>>, vector<32x32xf32>
    %cst_12 = arith.constant dense<0.000000e+00> : vector<32x16xf32>
    %34 = tpu.matmul %33, %32, %cst_12 {dimension_numbers = #tpu.dot_dimension_numbers<[1], [0], [0], [1], [0, 0, 1, 1], [], []>} : vector<32x32xf32>, vector<32x16xf32>, vector<32x16xf32> -> vector<32x16xf32>
    %35 = vector.broadcast %1 : vector<32x1xf32> to vector<32x16xf32>
    %36 = arith.addf %34, %35 : vector<32x16xf32>
    %cst_13 = arith.constant 0.000000e+00 : f32
    %37 = vector.broadcast %cst_13 : f32 to vector<32x16xf32>
    %38 = arith.maximumf %36, %37 : vector<32x16xf32>
    %c0_14 = arith.constant 0 : index
    %c38 = arith.constant 38 : index
    %39 = vector.load %arg3[%c0_14, %c38] : memref<32x71xf32, #tpu.memory_space<vmem>>, vector<32x32xf32>
    %cst_15 = arith.constant dense<0.000000e+00> : vector<32x16xf32>
    %40 = tpu.matmul %39, %38, %cst_15 {dimension_numbers = #tpu.dot_dimension_numbers<[1], [0], [0], [1], [0, 0, 1, 1], [], []>} : vector<32x32xf32>, vector<32x16xf32>, vector<32x16xf32> -> vector<32x16xf32>
    %41 = vector.broadcast %2 : vector<32x1xf32> to vector<32x16xf32>
    %42 = arith.addf %40, %41 : vector<32x16xf32>
    %c0_16 = arith.constant 0 : index
    %c0_17 = arith.constant 0 : index
    %43 = vector.load %arg4[%c0_16, %c0_17] : memref<16x2xf32, #tpu.memory_space<vmem>>, vector<16x2xf32>
    %cst_18 = arith.constant dense<0.000000e+00> : vector<32x2xf32>
    %44 = tpu.matmul %42, %43, %cst_18 {dimension_numbers = #tpu.dot_dimension_numbers<[1], [0], [0], [1], [0, 0, 1, 1], [], []>} : vector<32x16xf32>, vector<16x2xf32>, vector<32x2xf32> -> vector<32x2xf32>
    %45 = vector.shape_cast %44 : vector<32x2xf32> to vector<1x32x2xf32>
    %c0_19 = arith.constant 0 : index
    %c0_20 = arith.constant 0 : index
    %c0_21 = arith.constant 0 : index
    %46 = vector.load %arg5[%c0_19, %c0_20, %c0_21] : memref<1x32x2xf32, #tpu.memory_space<vmem>>, vector<1x32x2xf32>
    tpu.vector_store %arg5[%c0_19, %c0_20, %c0_21], %45 {strides = array<i32>} : memref<1x32x2xf32, #tpu.memory_space<vmem>>, vector<1x32x2xf32>,
    return
  }
  func.func @transform_0(%arg0: i32) -> (i32, i32) {
    %c0_i32 = arith.constant 0 : i32
    %c0_i32_0 = arith.constant 0 : i32
    return %c0_i32, %arg0 : i32, i32
  }
  func.func @transform_1(%arg0: i32) -> (i32, i32) {
    %c0_i32 = arith.constant 0 : i32
    %c0_i32_0 = arith.constant 0 : i32
    return %c0_i32, %arg0 : i32, i32
  }
  func.func @transform_2(%arg0: i32) -> (i32, i32) {
    %c0_i32 = arith.constant 0 : i32
    %c0_i32_0 = arith.constant 0 : i32
    %c0_i32_1 = arith.constant 0 : i32
    return %c0_i32, %c0_i32_0 : i32, i32
  }
  func.func @transform_3(%arg0: i32) -> (i32, i32) {
    %c0_i32 = arith.constant 0 : i32
    %c0_i32_0 = arith.constant 0 : i32
    %c0_i32_1 = arith.constant 0 : i32
    return %c0_i32, %c0_i32_0 : i32, i32
  }
  func.func @transform_4(%arg0: i32) -> (i32, i32, i32) {
    %c0_i32 = arith.constant 0 : i32
    %c0_i32_0 = arith.constant 0 : i32
    %c0_i32_1 = arith.constant 0 : i32
    return %arg0, %c0_i32, %c0_i32_0 : i32, i32, i32
  }
}

module attributes {stable_mosaic.version = 11 : i64} {
  func.func @_encoder_kernel(%arg0: i32, %arg1: memref<2x16xf32, #tpu.memory_space<vmem>>, %arg2: memref<2x16xf32, #tpu.memory_space<vmem>>, %arg3: memref<32x71xf32, #tpu.memory_space<vmem>>, %arg4: memref<16x2xf32, #tpu.memory_space<vmem>>, %arg5: memref<1x32x2xf32, #tpu.memory_space<vmem>>) attributes {dimension_semantics = [#tpu.dimension_semantics<parallel>], iteration_bounds = array<i64: 1>, scalar_prefetch = 0 : i64, scratch_operands = 0 : i64, tpu.core_type = #tpu.core_type<tc>, window_params = [{transform_indices = @transform_0, window_bounds = array<i64: 2, 16>}, {transform_indices = @transform_1, window_bounds = array<i64: 2, 16>}, {pipeline_mode = #tpu.pipeline_mode<synchronous>, transform_indices = @transform_2, window_bounds = array<i64: 32, 71>}, {pipeline_mode = #tpu.pipeline_mode<synchronous>, transform_indices = @transform_3, window_bounds = array<i64: 16, 2>}, {transform_indices = @transform_4, window_bounds = array<i64: 1, 32, 2>}]} {
    %c0 = arith.constant 0 : index
    %c4 = arith.constant 4 : index
    %0 = vector.load %arg3[%c0, %c4] : memref<32x71xf32, #tpu.memory_space<vmem>>, vector<32x1xf32>
    %c0_0 = arith.constant 0 : index
    %c37 = arith.constant 37 : index
    %1 = vector.load %arg3[%c0_0, %c37] : memref<32x71xf32, #tpu.memory_space<vmem>>, vector<32x1xf32>
    %c0_1 = arith.constant 0 : index
    %c70 = arith.constant 70 : index
    %2 = vector.load %arg3[%c0_1, %c70] : memref<32x71xf32, #tpu.memory_space<vmem>>, vector<32x1xf32>
    %c0_2 = arith.constant 0 : index
    %c0_3 = arith.constant 0 : index
    %3 = vector.load %arg1[%c0_2, %c0_3] : memref<2x16xf32, #tpu.memory_space<vmem>>, vector<2x16xf32>
    %c0_4 = arith.constant 0 : index
    %c0_5 = arith.constant 0 : index
    %4 = vector.load %arg2[%c0_4, %c0_5] : memref<2x16xf32, #tpu.memory_space<vmem>>, vector<2x16xf32>
    %5 = vector.shape_cast %0 : vector<32x1xf32> to vector<32x1xf32>
    %6 = vector.broadcast %5 : vector<32x1xf32> to vector<32x16xf32>
    %c0_6 = arith.constant 0 : index
    %c0_7 = arith.constant 0 : index
    %7 = vector.load %arg3[%c0_6, %c0_7] : memref<32x71xf32, #tpu.memory_space<vmem>>, vector<32x1xf32>
    %8 = vector.extract_strided_slice %3 {offsets = [0, 0], sizes = [1, 16], strides = [1, 1]} : vector<2x16xf32> to vector<1x16xf32>
    %9 = vector.broadcast %7 : vector<32x1xf32> to vector<32x16xf32>
    %10 = vector.broadcast %8 : vector<1x16xf32> to vector<32x16xf32>
    %11 = arith.mulf %9, %10 : vector<32x16xf32>
    %12 = arith.addf %6, %11 : vector<32x16xf32>
    %c0_8 = arith.constant 0 : index
    %c1 = arith.constant 1 : index
    %13 = vector.load %arg3[%c0_8, %c1] : memref<32x71xf32, #tpu.memory_space<vmem>>, vector<32x1xf32>
    %14 = vector.extract_strided_slice %3 {offsets = [1, 0], sizes = [1, 16], strides = [1, 1]} : vector<2x16xf32> to vector<1x16xf32>
    %15 = vector.broadcast %13 : vector<32x1xf32> to vector<32x16xf32>
    %16 = vector.broadcast %14 : vector<1x16xf32> to vector<32x16xf32>
    %17 = arith.mulf %15, %16 : vector<32x16xf32>
    %18 = arith.addf %12, %17 : vector<32x16xf32>
    %c0_9 = arith.constant 0 : index
    %c2 = arith.constant 2 : index
    %19 = vector.load %arg3[%c0_9, %c2] : memref<32x71xf32, #tpu.memory_space<vmem>>, vector<32x1xf32>
    %20 = vector.extract_strided_slice %4 {offsets = [0, 0], sizes = [1, 16], strides = [1, 1]} : vector<2x16xf32> to vector<1x16xf32>
    %21 = vector.broadcast %19 : vector<32x1xf32> to vector<32x16xf32>
    %22 = vector.broadcast %20 : vector<1x16xf32> to vector<32x16xf32>
    %23 = arith.mulf %21, %22 : vector<32x16xf32>
    %24 = arith.addf %18, %23 : vector<32x16xf32>
    %c0_10 = arith.constant 0 : index
    %c3 = arith.constant 3 : index
    %25 = vector.load %arg3[%c0_10, %c3] : memref<32x71xf32, #tpu.memory_space<vmem>>, vector<32x1xf32>
    %26 = vector.extract_strided_slice %4 {offsets = [1, 0], sizes = [1, 16], strides = [1, 1]} : vector<2x16xf32> to vector<1x16xf32>
    %27 = vector.broadcast %25 : vector<32x1xf32> to vector<32x16xf32>
    %28 = vector.broadcast %26 : vector<1x16xf32> to vector<32x16xf32>
    %29 = arith.mulf %27, %28 : vector<32x16xf32>
    %30 = arith.addf %24, %29 : vector<32x16xf32>
    %cst = arith.constant 0.000000e+00 : f32
    %31 = vector.broadcast %cst : f32 to vector<32x16xf32>
    %32 = arith.maximumf %30, %31 : vector<32x16xf32>
    %c0_11 = arith.constant 0 : index
    %c5 = arith.constant 5 : index
    %33 = vector.load %arg3[%c0_11, %c5] : memref<32x71xf32, #tpu.memory_space<vmem>>, vector<32x32xf32>
    %cst_12 = arith.constant dense<0.000000e+00> : vector<32x16xf32>
    %34 = tpu.matmul %33, %32, %cst_12 {dimension_numbers = #tpu.dot_dimension_numbers<[1], [0], [0], [1], [0, 0, 1, 1], [], []>} : vector<32x32xf32>, vector<32x16xf32>, vector<32x16xf32> -> vector<32x16xf32>
    %35 = vector.broadcast %1 : vector<32x1xf32> to vector<32x16xf32>
    %36 = arith.addf %34, %35 : vector<32x16xf32>
    %cst_13 = arith.constant 0.000000e+00 : f32
    %37 = vector.broadcast %cst_13 : f32 to vector<32x16xf32>
    %38 = arith.maximumf %36, %37 : vector<32x16xf32>
    %c0_14 = arith.constant 0 : index
    %c38 = arith.constant 38 : index
    %39 = vector.load %arg3[%c0_14, %c38] : memref<32x71xf32, #tpu.memory_space<vmem>>, vector<32x32xf32>
    %cst_15 = arith.constant dense<0.000000e+00> : vector<32x16xf32>
    %40 = tpu.matmul %39, %38, %cst_15 {dimension_numbers = #tpu.dot_dimension_numbers<[1], [0], [0], [1], [0, 0, 1, 1], [], []>} : vector<32x32xf32>, vector<32x16xf32>, vector<32x16xf32> -> vector<32x16xf32>
    %41 = vector.broadcast %2 : vector<32x1xf32> to vector<32x16xf32>
    %42 = arith.addf %40, %41 : vector<32x16xf32>
    %c0_16 = arith.constant 0 : index
    %c0_17 = arith.constant 0 : index
    %43 = vector.load %arg4[%c0_16, %c0_17] : memref<16x2xf32, #tpu.memory_space<vmem>>, vector<16x2xf32>
    %cst_18 = arith.constant dense<0.000000e+00> : vector<32x2xf32>
    %44 = tpu.matmul %42, %43, %cst_18 {dimension_numbers = #tpu.dot_dimension_numbers<[1], [0], [0], [1], [0, 0, 1, 1], [], []>} : vector<32x16xf32>, vector<16x2xf32>, vector<32x2xf32> -> vector<32x2xf32>
    %45 = vector.shape_cast %44 : vector<32x2xf32> to vector<1x32x2xf32>
    %c0_19 = arith.constant 0 : index
    %c0_20 = arith.constant 0 : index
    %c0_21 = arith.constant 0 : index
    %46 = vector.load %arg5[%c0_19, %c0_20, %c0_21] : memref<1x32x2xf32, #tpu.memory_space<vmem>>, vector<1x32x2xf32>
    tpu.vector_store %arg5[%c0_19, %c0_20, %c0_21], %45 {strides = array<i32>} : memref<1x32x2xf32, #tpu.memory_space<vmem>>, vector<1x32x2xf32>,
    return
  }
  func.func @transform_0(%arg0: i32) -> (i32, i32) {
    %c0_i32 = arith.constant 0 : i32
    %c0_i32_0 = arith.constant 0 : i32
    return %c0_i32, %arg0 : i32, i32
  }
  func.func @transform_1(%arg0: i32) -> (i32, i32) {
    %c0_i32 = arith.constant 0 : i32
    %c0_i32_0 = arith.constant 0 : i32
    return %c0_i32, %arg0 : i32, i32
  }
  func.func @transform_2(%arg0: i32) -> (i32, i32) {
    %c0_i32 = arith.constant 0 : i32
    %c0_i32_0 = arith.constant 0 : i32
    %c0_i32_1 = arith.constant 0 : i32
    return %c0_i32, %c0_i32_0 : i32, i32
  }
  func.func @transform_3(%arg0: i32) -> (i32, i32) {
    %c0_i32 = arith.constant 0 : i32
    %c0_i32_0 = arith.constant 0 : i32
    %c0_i32_1 = arith.constant 0 : i32
    return %c0_i32, %c0_i32_0 : i32, i32
  }
  func.func @transform_4(%arg0: i32) -> (i32, i32, i32) {
    %c0_i32 = arith.constant 0 : i32
    %c0_i32_0 = arith.constant 0 : i32
    %c0_i32_1 = arith.constant 0 : i32
    return %arg0, %c0_i32, %c0_i32_0 : i32, i32, i32
  }
}

</mosaic_0001>

<bundles_post_ra>
// kernel: tpu_custom_call.1
= control target key start
LH: loop header
LB: loop body
LE: loop exit
PB: predicated region body
PF: predicated region fallthrough
CT: control target
= control target key end

     0   :  { %9 = vsyncpa [#allocation3], 0  ;;  %s426_s18 = smov [#allocation2]   ;;  %s427_s20 = smov 128   ;;  %s542_s0 = inlined_call_operand.vmem [shape: f32[2,16], index: 0, kind: input, shape index: {}]   ;;  %s543_s1 = inlined_call_operand.vmem [shape: f32[2,16], index: 1, kind: input, shape index: {}]   ;;  %s544_s2 = inlined_call_operand.hbm [shape: f32[32,71], index: 2, kind: input, shape index: {}]   ;;  %s545_s3 = inlined_call_operand.vmem [shape: f32[16,2], index: 3, kind: input, shape index: {}]   ;;  %s546_s4 = inlined_call_operand.vmem [shape: f32[1,32,2], index: 4, kind: output, shape index: {}]  }
   0x1   :  { %s18_s17 = sshll.u32 %s544_s2, 4  ;;  %s20_s19 = sshll.u32 %s426_s18, 4  ;;  %s19_s17 = int_to_ptr.hbm [resolvable:$true] %s18_s17  ;;  %s21_s19 = int_to_ptr.vmem [resolvable:$true] %s20_s19 }
   0x2   :  { %s428_s21 = smov 8  }
   0x3   :  { %26 = dma.hbm_to_vmem [thread:$0]  %s19_s17, 512, %s21_s19, [#allocation3], %s427_s20, %s427_s20, %s428_s21  }
   0x4   :  { %424 = dma.done.wait [#allocation3], 512  }
   0x5   :  { %425 = vsyncadd [#allocation3], 4294966784  ;;  %v429_v0 = vmov 0   ;;  %v430_v1 = vmov 4   ;;  %v466_v2 = vld [vmem:[#allocation2 + $0x18] sm:$0xff]  ;;  %v468_v3 = vld [vmem:[#allocation2 + $0x10] sm:$0xff] }
   0x6   :  { %378 = vset.pattern.permute.xlu1 %v429_v0  ;;  %376 = vset.pattern.permute.xlu0 %v429_v0  ;;  %v473_v4 = vld [vmem:[#allocation2 + $0x8] sm:$0xff]  ;;  %v431_v5 = vmov 1   ;;  %v432_v6 = vmov 2   ;;  %v481_v7 = vld [vmem:[#allocation2] sm:$0xff]  ;;  %v433_v8 = vmov 3   ;;  %s434_s2 = smov 123  }
   0x7   :  { %380 = vset.pattern.permute.xlu2 %v430_v1  ;;  %72 = vperm.xlu0 %376, %v466_v2   ;;  %v37_v20 = vld [vmem:[%s542_s0] sm:$0x3]  ;;  %v435_v62 = vmov 37   ;;  %s436_s0 = smov 90   ;;  %vm187_vm0 = vcmask 261120   ;;  %vm292_vm1 = vcmask 130048  }
   0x8   :  { %51 = vperm.xlu2 %380, %v468_v3   ;;  %68 = vperm.xlu1 %378, %v468_v3   ;;  %v75_v21 = vperm.slane %v37_v20, 0  ;;  %v100_v23 = vperm.slane %v37_v20, 1  ;;  %v38_v25 = vld [vmem:[%s543_s1] sm:$0x3]  ;;  %v291_v20 = vld [vmem:[%s545_s3 + $0x8] sm:$0xff]  ;;  %vm334_vm2 = vcmask 15360  }
   0x9   :  { %v125_v28 = vperm.slane %v38_v25, 0  ;;  %v150_v36 = vperm.slane %v38_v25, 1  ;;  %319 = vmatpush.msra.mxu2 %v291_v20 }
   0xf   :  { %377 = vset.pattern.permute.xlu0 %v430_v1 }
  0x10   :  { %381 = vset.pattern.permute.xlu2 %v429_v0  ;;  %379 = vset.pattern.permute.xlu1 %v431_v5 }
  0x11   :  { %56 = vperm.xlu0 %377, %v466_v2   ;;  %97 = vperm.xlu1 %379, %v466_v2  }
  0x12   :  { %64 = vperm.xlu2 %381, %v473_v4  }
  0x19   :  { %46 = vperm.xlu0 %377, %v473_v4   ;;  %93 = vperm.xlu1 %379, %v468_v3  }
  0x1a   :  { %382 = vset.pattern.permute.xlu2 %v432_v6 }
  0x1b   :  { %122 = vperm.xlu2 %382, %v466_v2  }
  0x21   :  { %385 = vset.pattern.permute.xlu0 %v432_v6  ;;  %383 = vset.pattern.permute.xlu1 %v429_v0 }
  0x22   :  { %118 = vperm.xlu0 %385, %v468_v3   ;;  %60 = vperm.xlu1 %383, %v481_v7  }
  0x23   :  { %384 = vset.pattern.permute.xlu2 %v431_v5 }
  0x24   :  { %89 = vperm.xlu2 %384, %v473_v4  }
  0x2a   :  { %390 = vset.pattern.permute.xlu0 %v433_v8  ;;  %386 = vset.pattern.permute.xlu1 %v433_v8 }
  0x2b   :  { %143 = vperm.xlu0 %390, %v468_v3   ;;  %147 = vperm.xlu1 %386, %v466_v2  }
  0x2c   :  { %387 = vset.pattern.permute.xlu2 %v430_v1 }
  0x2d   :  { %41 = vperm.xlu2 %387, %v481_v7  }
  0x33   :  { %183 = vrot.lane.b32.xlu0 %v468_v3, %s434_s2  ;;  %388 = vset.pattern.permute.xlu1 %v431_v5 }
  0x34   :  { %85 = vperm.xlu1 %388, %v481_v7   ;;  %394 = vset.pattern.permute.xlu0 %v435_v62 }
  0x35   :  { %389 = vset.pattern.permute.xlu2 %v432_v6 }
  0x36   :  { %114 = vperm.xlu2 %389, %v473_v4  }
  0x3b   :  { %176 = vperm.xlu0 %394, %v466_v2  }
  0x3c   :  { %391 = vset.pattern.permute.xlu1 %v432_v6 }
  0x3d   :  { %110 = vperm.xlu1 %391, %v481_v7  }
  0x3e   :  { %392 = vset.pattern.permute.xlu2 %v433_v8 }
  0x3f   :  { %139 = vperm.xlu2 %392, %v473_v4  }
  0x43   :  { %247 = vrot.lane.b32.xlu0 %v473_v4, %s436_s0 }
  0x45   :  { %393 = vset.pattern.permute.xlu1 %v433_v8 }
  0x46   :  { %135 = vperm.xlu1 %393, %v481_v7  }
  0x47   :  { %181 = vrot.lane.b32.xlu2 %v473_v4, %s434_s2 }
  0x48   :  { %396 = vset.pattern.permute.xlu2 %v435_v62 }
  0x4e   :  { %185 = vrot.lane.b32.xlu1 %v466_v2, %s434_s2 }
  0x4f   :  { %179 = vrot.lane.b32.xlu2 %v481_v7, %s434_s2  ;;  %395 = vset.pattern.permute.xlu1 %v435_v62 }
  0x56   :  { %172 = vperm.xlu1 %395, %v468_v3  }
  0x57   :  { %168 = vperm.xlu2 %396, %v473_v4  }
  0x5e   :  { %164 = vperm.xlu1 %395, %v481_v7  }
  0x5f   :  { %245 = vrot.lane.b32.xlu2 %v481_v7, %s436_s0 }
  0x62   :  { %v52_v9 = vpop.permute.xlu2 %51 }
  0x66   :  { %249 = vrot.lane.b32.xlu1 %v468_v3, %s436_s0 }
  0x67   :  { %251 = vrot.lane.b32.xlu2 %v466_v2, %s436_s0 }
  0x6c   :  { %v65_v10 = vpop.permute.xlu2 %64 }
  0x6d   :  { %v77_v31 = vmul.f32 %v75_v21, %v65_v10 }
  0x75   :  { %v123_v11 = vpop.permute.xlu2 %122 }
  0x76   :  { %v129_v34 = vmul.f32 %v125_v28, %v123_v11 }
  0x79   :  { %v73_v12 = vpop.permute.xlu0 %72 }
  0x7a   :  { %v69_v13 = vpop.permute.xlu1 %68  ;;  %v79_v22 = vmul.f32 %v75_v21, %v73_v12 }
  0x7b   :  { %v78_v32 = vmul.f32 %v75_v21, %v69_v13 }
  0x7d   :  { %v82_v37 = vadd.f32 %v78_v32, %v52_v9 }
  0x7e   :  { %v90_v14 = vpop.permute.xlu2 %89 }
  0x7f   :  { %v102_v38 = vmul.f32 %v100_v23, %v90_v14 }
  0x83   :  { %v57_v15 = vpop.permute.xlu0 %56  ;;  %v98_v16 = vpop.permute.xlu1 %97 }
  0x84   :  { %v83_v29 = vadd.f32 %v79_v22, %v57_v15  ;;  %v104_v30 = vmul.f32 %v100_v23, %v98_v16 }
  0x86   :  { %v108_v35 = vadd.f32 %v104_v30, %v83_v29 }
  0x87   :  { %v42_v17 = vpop.permute.xlu2 %41 }
  0x88   :  { %v133_v47 = vadd.f32 %v129_v34, %v108_v35  ;;  %v290_v34 = vld [vmem:[%s545_s3] sm:$0xff] }
  0x89   :  { %320 = vmatpush.msra.mxu2 %v290_v34 }
  0x8b   :  { %v47_v18 = vpop.permute.xlu0 %46  ;;  %v94_v19 = vpop.permute.xlu1 %93 }
  0x8c   :  { %v103_v33 = vmul.f32 %v100_v23, %v94_v19  ;;  %v81_v39 = vadd.f32 %v77_v31, %v47_v18 }
  0x8e   :  { %v107_v42 = vadd.f32 %v103_v33, %v82_v37  ;;  %v106_v48 = vadd.f32 %v102_v38, %v81_v39 }
  0x90   :  { %v115_v24 = vpop.permute.xlu2 %114 }
  0x91   :  { %v127_v43 = vmul.f32 %v125_v28, %v115_v24 }
  0x93   :  { %v131_v52 = vadd.f32 %v127_v43, %v106_v48 }
  0x94   :  { %v119_v26 = vpop.permute.xlu0 %118  ;;  %v61_v27 = vpop.permute.xlu1 %60 }
  0x95   :  { %v128_v40 = vmul.f32 %v125_v28, %v119_v26  ;;  %v76_v61 = vmul.f32 %v75_v21, %v61_v27 }
  0x97   :  { %v132_v49 = vadd.f32 %v128_v40, %v107_v42  ;;  %v80_v0 = vadd.f32 %v76_v61, %v42_v17  ;;  %v437_v17 = vmov 70  }
  0x98   :  { %397 = vset.pattern.permute.xlu0 %v437_v17  ;;  %398 = vset.pattern.permute.xlu1 %v437_v17 }
  0x99   :  { %v140_v41 = vpop.permute.xlu2 %139  ;;  %230 = vperm.xlu0 %397, %v481_v7   ;;  %234 = vperm.xlu1 %398, %v473_v4  }
  0x9a   :  { %v152_v50 = vmul.f32 %v150_v36, %v140_v41  ;;  %399 = vset.pattern.permute.xlu2 %v437_v17 }
  0x9b   :  { %238 = vperm.xlu2 %399, %v468_v3  }
  0x9c   :  { %v156_v56 = vadd.f32 %v152_v50, %v131_v52 }
  0x9d   :  { %v144_v44 = vpop.permute.xlu0 %143  ;;  %v148_v46 = vpop.permute.xlu1 %147 }
  0x9e   :  { %v153_v45 = vmul.f32 %v150_v36, %v144_v44  ;;  %v154_v51 = vmul.f32 %v150_v36, %v148_v46  ;;  %v160_v59 = vmax.f32 %v156_v56, 0.0 }
  0xa0   :  { %v158_v53 = vadd.f32 %v154_v51, %v133_v47  ;;  %v157_v54 = vadd.f32 %v153_v45, %v132_v49 }
  0xa1   :  { %v182_v5 = vpop.permute.xlu2 %181  ;;  %242 = vperm.xlu1 %398, %v466_v2  }
  0xa2   :  { %v162_v55 = vmax.f32 %v158_v53, 0.0  ;;  %v161_v57 = vmax.f32 %v157_v54, 0.0 }
  0xa4   :  { %208 = vmatpush.msra.mxu0 %v162_v55  ;;  %356 = vmatpush.msra.mxu3 %v162_v55 }
  0xa5   :  { %v184_v14 = vpop.permute.xlu0 %183 }
  0xa6   :  { %209 = vmatpush.msra.mxu0 %v161_v57  ;;  %357 = vmatpush.msra.mxu3 %v161_v57  ;;  %v86_v58 = vpop.permute.xlu1 %85 }
  0xa7   :  { %v101_v63 = vmul.f32 %v100_v23, %v86_v58 }
  0xa8   :  { %210 = vmatpush.msra.mxu0 %v160_v59  ;;  %358 = vmatpush.msra.mxu3 %v160_v59 }
  0xa9   :  { %v105_v6 = vadd.f32 %v101_v63, %v80_v0  ;;  %v180_v13 = vpop.permute.xlu2 %179 }
  0xad   :  { %v177_v21 = vpop.permute.xlu0 %176 }
  0xaf   :  { %v111_v60 = vpop.permute.xlu1 %110 }
  0xb0   :  { %v126_v1 = vmul.f32 %v125_v28, %v111_v60 }
  0xb1   :  { %v169_v22 = vpop.permute.xlu2 %168 }
  0xb2   :  { %v130_v9 = vadd.f32 %v126_v1, %v105_v6 }
  0xb5   :  { %v248_v31 = vpop.permute.xlu0 %247 }
  0xb8   :  { %v136_v8 = vpop.permute.xlu1 %135 }
  0xb9   :  { %v151_v10 = vmul.f32 %v150_v36, %v136_v8  ;;  %v246_v2 = vpop.permute.xlu2 %245 }
  0xbb   :  { %v155_v11 = vadd.f32 %v151_v10, %v130_v9 }
  0xbd   :  { %v159_v12 = vmax.f32 %v155_v11, 0.0 }
  0xbf   :  { %211 = vmatpush.msra.mxu0 %v159_v12  ;;  %359 = vmatpush.msra.mxu3 %v159_v12 }
  0xc0   :  { %345 = vmatmul.msk.f32.vlgmr.msra.gmra.mxu3 %vm187_vm0, %v182_v5  ;;  %344 = vmatmul.msk.f32.vlgmr.msra.gmra.mxu0 %vm187_vm0, %v180_v13  ;;  %v186_v15 = vpop.permute.xlu1 %185 }
  0xc1   :  { %v252_v33 = vpop.permute.xlu2 %251 }
  0xc8   :  { %346 = vmatmul.msk.f32.gmra.mxu3 %vm187_vm0, %v184_v14  ;;  %v173_v18 = vpop.permute.xlu1 %172 }
  0xd0   :  { %347 = vmatmul.msk.f32.gmra.mxu3 %vm187_vm0, %v186_v15  ;;  %v165_v26 = vpop.permute.xlu1 %164 }
  0xd8   :  { %v250_v32 = vpop.permute.xlu1 %249 }
  0xf5   :  { %v239_v42 = vpop.permute.xlu2 %238 }
 0x10b   :  { %v231_v35 = vpop.permute.xlu0 %230  ;;  %v235_v39 = vpop.permute.xlu1 %234 }
 0x113   :  { %v243_v45 = vpop.permute.xlu1 %242 }
 0x13d   :  { %v213_v7 = vpop.f32.mrf.mxu0 }
 0x13e   :  { %v214_v29 = vadd.f32 %v213_v7, %v165_v26 }
 0x140   :  { %v225_v30 = vmax.f32 %v214_v29, 0.0 }
 0x143   :  { %v216_v16 = vpop.f32.mrf.mxu3 }
 0x144   :  { %v217_v4 = vadd.f32 %v216_v16, %v169_v22 }
 0x146   :  { %v226_v3 = vmax.f32 %v217_v4, 0.0 }
 0x14b   :  { %v219_v19 = vpop.f32.mrf.mxu3 }
 0x14c   :  { %v220_v24 = vadd.f32 %v219_v19, %v173_v18 }
 0x14e   :  { %v227_v28 = vmax.f32 %v220_v24, 0.0 }
 0x153   :  { %v222_v23 = vpop.f32.mrf.mxu3 }
 0x154   :  { %v223_v25 = vadd.f32 %v222_v23, %v177_v21 }
 0x156   :  { %v228_v27 = vmax.f32 %v223_v25, 0.0 }
 0x158   :  { %273 = vmatpush.msrb.mxu0 %v228_v27  ;;  %360 = vmatpush.msra.mxu1 %v228_v27 }
 0x15a   :  { %274 = vmatpush.msrb.mxu0 %v227_v28  ;;  %361 = vmatpush.msra.mxu1 %v227_v28 }
 0x15c   :  { %275 = vmatpush.msrb.mxu0 %v226_v3  ;;  %362 = vmatpush.msra.mxu1 %v226_v3 }
 0x15e   :  { %276 = vmatpush.msrb.mxu0 %v225_v30  ;;  %363 = vmatpush.msra.mxu1 %v225_v30 }
 0x15f   :  { %348 = vmatmul.msk.f32.vlgmr.msrb.gmra.mxu0 %vm187_vm0, %v246_v2  ;;  %349 = vmatmul.msk.f32.vlgmr.msra.gmra.mxu1 %vm187_vm0, %v248_v31 }
 0x167   :  { %350 = vmatmul.msk.f32.gmra.mxu1 %vm187_vm0, %v250_v32 }
 0x16f   :  { %351 = vmatmul.msk.f32.gmra.mxu1 %vm187_vm0, %v252_v33 }
 0x1dc   :  { %v278_v36 = vpop.f32.mrf.mxu0  ;;  %v281_v38 = vpop.f32.mrf.mxu1 }
 0x1dd   :  { %v279_v37 = vadd.f32 %v278_v36, %v231_v35  ;;  %v282_v40 = vadd.f32 %v281_v38, %v235_v39 }
 0x1df   :  { %352 = vmatmul.msk.f32.vlgmr.msra.gmra.mxu2 %vm292_vm1, %v279_v37 }
 0x1e4   :  { %v284_v41 = vpop.f32.mrf.mxu1 }
 0x1e5   :  { %v285_v43 = vadd.f32 %v284_v41, %v239_v42 }
 0x1e7   :  { %353 = vmatmul.msk.f32.gmra.mxu2 %vm292_vm1, %v282_v40 }
 0x1ec   :  { %v287_v44 = vpop.f32.mrf.mxu1 }
 0x1ed   :  { %v288_v46 = vadd.f32 %v287_v44, %v243_v45 }
 0x1ef   :  { %354 = vmatmul.msk.f32.gmra.mxu2 %vm292_vm1, %v285_v43 }
 0x1f7   :  { %355 = vmatmul.msk.f32.gmra.mxu2 %vm292_vm1, %v288_v46 }
 0x262   :  { %v322_v47 = vpop.f32.mrf.mxu2 }
 0x263   :  { %335 = vst.msk [vmem:[%s546_s4] sm:$0xff] %vm334_vm2, %v322_v47 }
 0x26a   :  { %v325_v48 = vpop.f32.mrf.mxu2 }
 0x26b   :  { %336 = vst.msk [vmem:[%s546_s4 + $0x8] sm:$0xff] %vm334_vm2, %v325_v48 }
 0x272   :  { %v328_v49 = vpop.f32.mrf.mxu2 }
 0x273   :  { %337 = vst.msk [vmem:[%s546_s4 + $0x10] sm:$0xff] %vm334_vm2, %v328_v49 }
 0x27a   :  { %v331_v50 = vpop.f32.mrf.mxu2 }
 0x27b   :  { %338 = vst.msk [vmem:[%s546_s4 + $0x18] sm:$0xff] %vm334_vm2, %v331_v50 }
 0x27c   :  { %343 = vsyncpa [#allocation3], 1 }

// kernel: tpu_custom_call.1
= control target key start
LH: loop header
LB: loop body
LE: loop exit
PB: predicated region body
PF: predicated region fallthrough
CT: control target
= control target key end

     0   :  { %9 = vsyncpa [#allocation3], 0  ;;  %s426_s18 = smov [#allocation2]   ;;  %s427_s20 = smov 128   ;;  %s542_s0 = inlined_call_operand.vmem [shape: f32[2,16], index: 0, kind: input, shape index: {}]   ;;  %s543_s1 = inlined_call_operand.vmem [shape: f32[2,16], index: 1, kind: input, shape index: {}]   ;;  %s544_s2 = inlined_call_operand.hbm [shape: f32[32,71], index: 2, kind: input, shape index: {}]   ;;  %s545_s3 = inlined_call_operand.vmem [shape: f32[16,2], index: 3, kind: input, shape index: {}]   ;;  %s546_s4 = inlined_call_operand.vmem [shape: f32[1,32,2], index: 4, kind: output, shape index: {}]  }
   0x1   :  { %s18_s17 = sshll.u32 %s544_s2, 4  ;;  %s20_s19 = sshll.u32 %s426_s18, 4  ;;  %s19_s17 = int_to_ptr.hbm [resolvable:$true] %s18_s17  ;;  %s21_s19 = int_to_ptr.vmem [resolvable:$true] %s20_s19 }
   0x2   :  { %s428_s21 = smov 8  }
   0x3   :  { %26 = dma.hbm_to_vmem [thread:$0]  %s19_s17, 512, %s21_s19, [#allocation3], %s427_s20, %s427_s20, %s428_s21  }
   0x4   :  { %424 = dma.done.wait [#allocation3], 512  }
   0x5   :  { %425 = vsyncadd [#allocation3], 4294966784  ;;  %v429_v0 = vmov 0   ;;  %v430_v1 = vmov 4   ;;  %v466_v2 = vld [vmem:[#allocation2 + $0x18] sm:$0xff]  ;;  %v468_v3 = vld [vmem:[#allocation2 + $0x10] sm:$0xff] }
   0x6   :  { %378 = vset.pattern.permute.xlu1 %v429_v0  ;;  %376 = vset.pattern.permute.xlu0 %v429_v0  ;;  %v473_v4 = vld [vmem:[#allocation2 + $0x8] sm:$0xff]  ;;  %v431_v5 = vmov 1   ;;  %v432_v6 = vmov 2   ;;  %v481_v7 = vld [vmem:[#allocation2] sm:$0xff]  ;;  %v433_v8 = vmov 3   ;;  %s434_s2 = smov 123  }
   0x7   :  { %380 = vset.pattern.permute.xlu2 %v430_v1  ;;  %72 = vperm.xlu0 %376, %v466_v2   ;;  %v37_v20 = vld [vmem:[%s542_s0] sm:$0x3]  ;;  %v435_v62 = vmov 37   ;;  %s436_s0 = smov 90   ;;  %vm187_vm0 = vcmask 261120   ;;  %vm292_vm1 = vcmask 130048  }
   0x8   :  { %51 = vperm.xlu2 %380, %v468_v3   ;;  %68 = vperm.xlu1 %378, %v468_v3   ;;  %v75_v21 = vperm.slane %v37_v20, 0  ;;  %v100_v23 = vperm.slane %v37_v20, 1  ;;  %v38_v25 = vld [vmem:[%s543_s1] sm:$0x3]  ;;  %v291_v20 = vld [vmem:[%s545_s3 + $0x8] sm:$0xff]  ;;  %vm334_vm2 = vcmask 15360  }
   0x9   :  { %v125_v28 = vperm.slane %v38_v25, 0  ;;  %v150_v36 = vperm.slane %v38_v25, 1  ;;  %319 = vmatpush.msra.mxu2 %v291_v20 }
   0xf   :  { %377 = vset.pattern.permute.xlu0 %v430_v1 }
  0x10   :  { %381 = vset.pattern.permute.xlu2 %v429_v0  ;;  %379 = vset.pattern.permute.xlu1 %v431_v5 }
  0x11   :  { %56 = vperm.xlu0 %377, %v466_v2   ;;  %97 = vperm.xlu1 %379, %v466_v2  }
  0x12   :  { %64 = vperm.xlu2 %381, %v473_v4  }
  0x19   :  { %46 = vperm.xlu0 %377, %v473_v4   ;;  %93 = vperm.xlu1 %379, %v468_v3  }
  0x1a   :  { %382 = vset.pattern.permute.xlu2 %v432_v6 }
  0x1b   :  { %122 = vperm.xlu2 %382, %v466_v2  }
  0x21   :  { %385 = vset.pattern.permute.xlu0 %v432_v6  ;;  %383 = vset.pattern.permute.xlu1 %v429_v0 }
  0x22   :  { %118 = vperm.xlu0 %385, %v468_v3   ;;  %60 = vperm.xlu1 %383, %v481_v7  }
  0x23   :  { %384 = vset.pattern.permute.xlu2 %v431_v5 }
  0x24   :  { %89 = vperm.xlu2 %384, %v473_v4  }
  0x2a   :  { %390 = vset.pattern.permute.xlu0 %v433_v8  ;;  %386 = vset.pattern.permute.xlu1 %v433_v8 }
  0x2b   :  { %143 = vperm.xlu0 %390, %v468_v3   ;;  %147 = vperm.xlu1 %386, %v466_v2  }
  0x2c   :  { %387 = vset.pattern.permute.xlu2 %v430_v1 }
  0x2d   :  { %41 = vperm.xlu2 %387, %v481_v7  }
  0x33   :  { %183 = vrot.lane.b32.xlu0 %v468_v3, %s434_s2  ;;  %388 = vset.pattern.permute.xlu1 %v431_v5 }
  0x34   :  { %85 = vperm.xlu1 %388, %v481_v7   ;;  %394 = vset.pattern.permute.xlu0 %v435_v62 }
  0x35   :  { %389 = vset.pattern.permute.xlu2 %v432_v6 }
  0x36   :  { %114 = vperm.xlu2 %389, %v473_v4  }
  0x3b   :  { %176 = vperm.xlu0 %394, %v466_v2  }
  0x3c   :  { %391 = vset.pattern.permute.xlu1 %v432_v6 }
  0x3d   :  { %110 = vperm.xlu1 %391, %v481_v7  }
  0x3e   :  { %392 = vset.pattern.permute.xlu2 %v433_v8 }
  0x3f   :  { %139 = vperm.xlu2 %392, %v473_v4  }
  0x43   :  { %247 = vrot.lane.b32.xlu0 %v473_v4, %s436_s0 }
  0x45   :  { %393 = vset.pattern.permute.xlu1 %v433_v8 }
  0x46   :  { %135 = vperm.xlu1 %393, %v481_v7  }
  0x47   :  { %181 = vrot.lane.b32.xlu2 %v473_v4, %s434_s2 }
  0x48   :  { %396 = vset.pattern.permute.xlu2 %v435_v62 }
  0x4e   :  { %185 = vrot.lane.b32.xlu1 %v466_v2, %s434_s2 }
  0x4f   :  { %179 = vrot.lane.b32.xlu2 %v481_v7, %s434_s2  ;;  %395 = vset.pattern.permute.xlu1 %v435_v62 }
  0x56   :  { %172 = vperm.xlu1 %395, %v468_v3  }
  0x57   :  { %168 = vperm.xlu2 %396, %v473_v4  }
  0x5e   :  { %164 = vperm.xlu1 %395, %v481_v7  }
  0x5f   :  { %245 = vrot.lane.b32.xlu2 %v481_v7, %s436_s0 }
  0x62   :  { %v52_v9 = vpop.permute.xlu2 %51 }
  0x66   :  { %249 = vrot.lane.b32.xlu1 %v468_v3, %s436_s0 }
  0x67   :  { %251 = vrot.lane.b32.xlu2 %v466_v2, %s436_s0 }
  0x6c   :  { %v65_v10 = vpop.permute.xlu2 %64 }
  0x6d   :  { %v77_v31 = vmul.f32 %v75_v21, %v65_v10 }
  0x75   :  { %v123_v11 = vpop.permute.xlu2 %122 }
  0x76   :  { %v129_v34 = vmul.f32 %v125_v28, %v123_v11 }
  0x79   :  { %v73_v12 = vpop.permute.xlu0 %72 }
  0x7a   :  { %v69_v13 = vpop.permute.xlu1 %68  ;;  %v79_v22 = vmul.f32 %v75_v21, %v73_v12 }
  0x7b   :  { %v78_v32 = vmul.f32 %v75_v21, %v69_v13 }
  0x7d   :  { %v82_v37 = vadd.f32 %v78_v32, %v52_v9 }
  0x7e   :  { %v90_v14 = vpop.permute.xlu2 %89 }
  0x7f   :  { %v102_v38 = vmul.f32 %v100_v23, %v90_v14 }
  0x83   :  { %v57_v15 = vpop.permute.xlu0 %56  ;;  %v98_v16 = vpop.permute.xlu1 %97 }
  0x84   :  { %v83_v29 = vadd.f32 %v79_v22, %v57_v15  ;;  %v104_v30 = vmul.f32 %v100_v23, %v98_v16 }
  0x86   :  { %v108_v35 = vadd.f32 %v104_v30, %v83_v29 }
  0x87   :  { %v42_v17 = vpop.permute.xlu2 %41 }
  0x88   :  { %v133_v47 = vadd.f32 %v129_v34, %v108_v35  ;;  %v290_v34 = vld [vmem:[%s545_s3] sm:$0xff] }
  0x89   :  { %320 = vmatpush.msra.mxu2 %v290_v34 }
  0x8b   :  { %v47_v18 = vpop.permute.xlu0 %46  ;;  %v94_v19 = vpop.permute.xlu1 %93 }
  0x8c   :  { %v103_v33 = vmul.f32 %v100_v23, %v94_v19  ;;  %v81_v39 = vadd.f32 %v77_v31, %v47_v18 }
  0x8e   :  { %v107_v42 = vadd.f32 %v103_v33, %v82_v37  ;;  %v106_v48 = vadd.f32 %v102_v38, %v81_v39 }
  0x90   :  { %v115_v24 = vpop.permute.xlu2 %114 }
  0x91   :  { %v127_v43 = vmul.f32 %v125_v28, %v115_v24 }
  0x93   :  { %v131_v52 = vadd.f32 %v127_v43, %v106_v48 }
  0x94   :  { %v119_v26 = vpop.permute.xlu0 %118  ;;  %v61_v27 = vpop.permute.xlu1 %60 }
  0x95   :  { %v128_v40 = vmul.f32 %v125_v28, %v119_v26  ;;  %v76_v61 = vmul.f32 %v75_v21, %v61_v27 }
  0x97   :  { %v132_v49 = vadd.f32 %v128_v40, %v107_v42  ;;  %v80_v0 = vadd.f32 %v76_v61, %v42_v17  ;;  %v437_v17 = vmov 70  }
  0x98   :  { %397 = vset.pattern.permute.xlu0 %v437_v17  ;;  %398 = vset.pattern.permute.xlu1 %v437_v17 }
  0x99   :  { %v140_v41 = vpop.permute.xlu2 %139  ;;  %230 = vperm.xlu0 %397, %v481_v7   ;;  %234 = vperm.xlu1 %398, %v473_v4  }
  0x9a   :  { %v152_v50 = vmul.f32 %v150_v36, %v140_v41  ;;  %399 = vset.pattern.permute.xlu2 %v437_v17 }
  0x9b   :  { %238 = vperm.xlu2 %399, %v468_v3  }
  0x9c   :  { %v156_v56 = vadd.f32 %v152_v50, %v131_v52 }
  0x9d   :  { %v144_v44 = vpop.permute.xlu0 %143  ;;  %v148_v46 = vpop.permute.xlu1 %147 }
  0x9e   :  { %v153_v45 = vmul.f32 %v150_v36, %v144_v44  ;;  %v154_v51 = vmul.f32 %v150_v36, %v148_v46  ;;  %v160_v59 = vmax.f32 %v156_v56, 0.0 }
  0xa0   :  { %v158_v53 = vadd.f32 %v154_v51, %v133_v47  ;;  %v157_v54 = vadd.f32 %v153_v45, %v132_v49 }
  0xa1   :  { %v182_v5 = vpop.permute.xlu2 %181  ;;  %242 = vperm.xlu1 %398, %v466_v2  }
  0xa2   :  { %v162_v55 = vmax.f32 %v158_v53, 0.0  ;;  %v161_v57 = vmax.f32 %v157_v54, 0.0 }
  0xa4   :  { %208 = vmatpush.msra.mxu0 %v162_v55  ;;  %356 = vmatpush.msra.mxu3 %v162_v55 }
  0xa5   :  { %v184_v14 = vpop.permute.xlu0 %183 }
  0xa6   :  { %209 = vmatpush.msra.mxu0 %v161_v57  ;;  %357 = vmatpush.msra.mxu3 %v161_v57  ;;  %v86_v58 = vpop.permute.xlu1 %85 }
  0xa7   :  { %v101_v63 = vmul.f32 %v100_v23, %v86_v58 }
  0xa8   :  { %210 = vmatpush.msra.mxu0 %v160_v59  ;;  %358 = vmatpush.msra.mxu3 %v160_v59 }
  0xa9   :  { %v105_v6 = vadd.f32 %v101_v63, %v80_v0  ;;  %v180_v13 = vpop.permute.xlu2 %179 }
  0xad   :  { %v177_v21 = vpop.permute.xlu0 %176 }
  0xaf   :  { %v111_v60 = vpop.permute.xlu1 %110 }
  0xb0   :  { %v126_v1 = vmul.f32 %v125_v28, %v111_v60 }
  0xb1   :  { %v169_v22 = vpop.permute.xlu2 %168 }
  0xb2   :  { %v130_v9 = vadd.f32 %v126_v1, %v105_v6 }
  0xb5   :  { %v248_v31 = vpop.permute.xlu0 %247 }
  0xb8   :  { %v136_v8 = vpop.permute.xlu1 %135 }
  0xb9   :  { %v151_v10 = vmul.f32 %v150_v36, %v136_v8  ;;  %v246_v2 = vpop.permute.xlu2 %245 }
  0xbb   :  { %v155_v11 = vadd.f32 %v151_v10, %v130_v9 }
  0xbd   :  { %v159_v12 = vmax.f32 %v155_v11, 0.0 }
  0xbf   :  { %211 = vmatpush.msra.mxu0 %v159_v12  ;;  %359 = vmatpush.msra.mxu3 %v159_v12 }
  0xc0   :  { %345 = vmatmul.msk.f32.vlgmr.msra.gmra.mxu3 %vm187_vm0, %v182_v5  ;;  %344 = vmatmul.msk.f32.vlgmr.msra.gmra.mxu0 %vm187_vm0, %v180_v13  ;;  %v186_v15 = vpop.permute.xlu1 %185 }
  0xc1   :  { %v252_v33 = vpop.permute.xlu2 %251 }
  0xc8   :  { %346 = vmatmul.msk.f32.gmra.mxu3 %vm187_vm0, %v184_v14  ;;  %v173_v18 = vpop.permute.xlu1 %172 }
  0xd0   :  { %347 = vmatmul.msk.f32.gmra.mxu3 %vm187_vm0, %v186_v15  ;;  %v165_v26 = vpop.permute.xlu1 %164 }
  0xd8   :  { %v250_v32 = vpop.permute.xlu1 %249 }
  0xf5   :  { %v239_v42 = vpop.permute.xlu2 %238 }
 0x10b   :  { %v231_v35 = vpop.permute.xlu0 %230  ;;  %v235_v39 = vpop.permute.xlu1 %234 }
 0x113   :  { %v243_v45 = vpop.permute.xlu1 %242 }
 0x13d   :  { %v213_v7 = vpop.f32.mrf.mxu0 }
 0x13e   :  { %v214_v29 = vadd.f32 %v213_v7, %v165_v26 }
 0x140   :  { %v225_v30 = vmax.f32 %v214_v29, 0.0 }
 0x143   :  { %v216_v16 = vpop.f32.mrf.mxu3 }
 0x144   :  { %v217_v4 = vadd.f32 %v216_v16, %v169_v22 }
 0x146   :  { %v226_v3 = vmax.f32 %v217_v4, 0.0 }
 0x14b   :  { %v219_v19 = vpop.f32.mrf.mxu3 }
 0x14c   :  { %v220_v24 = vadd.f32 %v219_v19, %v173_v18 }
 0x14e   :  { %v227_v28 = vmax.f32 %v220_v24, 0.0 }
 0x153   :  { %v222_v23 = vpop.f32.mrf.mxu3 }
 0x154   :  { %v223_v25 = vadd.f32 %v222_v23, %v177_v21 }
 0x156   :  { %v228_v27 = vmax.f32 %v223_v25, 0.0 }
 0x158   :  { %273 = vmatpush.msrb.mxu0 %v228_v27  ;;  %360 = vmatpush.msra.mxu1 %v228_v27 }
 0x15a   :  { %274 = vmatpush.msrb.mxu0 %v227_v28  ;;  %361 = vmatpush.msra.mxu1 %v227_v28 }
 0x15c   :  { %275 = vmatpush.msrb.mxu0 %v226_v3  ;;  %362 = vmatpush.msra.mxu1 %v226_v3 }
 0x15e   :  { %276 = vmatpush.msrb.mxu0 %v225_v30  ;;  %363 = vmatpush.msra.mxu1 %v225_v30 }
 0x15f   :  { %348 = vmatmul.msk.f32.vlgmr.msrb.gmra.mxu0 %vm187_vm0, %v246_v2  ;;  %349 = vmatmul.msk.f32.vlgmr.msra.gmra.mxu1 %vm187_vm0, %v248_v31 }
 0x167   :  { %350 = vmatmul.msk.f32.gmra.mxu1 %vm187_vm0, %v250_v32 }
 0x16f   :  { %351 = vmatmul.msk.f32.gmra.mxu1 %vm187_vm0, %v252_v33 }
 0x1dc   :  { %v278_v36 = vpop.f32.mrf.mxu0  ;;  %v281_v38 = vpop.f32.mrf.mxu1 }
 0x1dd   :  { %v279_v37 = vadd.f32 %v278_v36, %v231_v35  ;;  %v282_v40 = vadd.f32 %v281_v38, %v235_v39 }
 0x1df   :  { %352 = vmatmul.msk.f32.vlgmr.msra.gmra.mxu2 %vm292_vm1, %v279_v37 }
 0x1e4   :  { %v284_v41 = vpop.f32.mrf.mxu1 }
 0x1e5   :  { %v285_v43 = vadd.f32 %v284_v41, %v239_v42 }
 0x1e7   :  { %353 = vmatmul.msk.f32.gmra.mxu2 %vm292_vm1, %v282_v40 }
 0x1ec   :  { %v287_v44 = vpop.f32.mrf.mxu1 }
 0x1ed   :  { %v288_v46 = vadd.f32 %v287_v44, %v243_v45 }
 0x1ef   :  { %354 = vmatmul.msk.f32.gmra.mxu2 %vm292_vm1, %v285_v43 }
 0x1f7   :  { %355 = vmatmul.msk.f32.gmra.mxu2 %vm292_vm1, %v288_v46 }
 0x262   :  { %v322_v47 = vpop.f32.mrf.mxu2 }
 0x263   :  { %335 = vst.msk [vmem:[%s546_s4] sm:$0xff] %vm334_vm2, %v322_v47 }
 0x26a   :  { %v325_v48 = vpop.f32.mrf.mxu2 }
 0x26b   :  { %336 = vst.msk [vmem:[%s546_s4 + $0x8] sm:$0xff] %vm334_vm2, %v325_v48 }
 0x272   :  { %v328_v49 = vpop.f32.mrf.mxu2 }
 0x273   :  { %337 = vst.msk [vmem:[%s546_s4 + $0x10] sm:$0xff] %vm334_vm2, %v328_v49 }
 0x27a   :  { %v331_v50 = vpop.f32.mrf.mxu2 }
 0x27b   :  { %338 = vst.msk [vmem:[%s546_s4 + $0x18] sm:$0xff] %vm334_vm2, %v331_v50 }
 0x27c   :  { %343 = vsyncpa [#allocation3], 1 }

</bundles_post_ra>
